<compile_context>
chip_gen: v5e
topology: v5e:2x2
jax: 0.10.0
libtpu: 0.0.40
codegen_flags: <defaults>
</compile_context>

<pallas_src>
import functools

import jax
import jax.numpy as jnp
from jax.experimental import pallas as pl
from jax.experimental.pallas import tpu as pltpu

K = 5      # kernel size
PAD = 2    # ConvTranspose1d padding (stride=1, output_padding=0 -> out length == in length)

# Per-step lane budget: keeps the f32 register accumulator (C_out x lanes) and the
# double-buffered input/output blocks small (well under v7x's 64 MiB VMEM and the
# default 32 MiB scoped limit) while still giving lane-dense, multiple-of-128 stores.
_MAX_LANES = 2048


def _outconv_kernel(x_ref, w_ref, b_ref, o_ref, *, L):
    """One grid step = B_TILE batch elements folded into the lane axis.

    x_ref: (C_in,  B_TILE*L)  unpadded input slab; lane = b*L + t
    w_ref: (K, C_out, C_in)   cross-correlation weights, w[k, co, ci] = W_convT[ci, co, K-1-k]
    b_ref: (C_out, 1)         bias
    o_ref: (C_out, B_TILE*L)  output slab, same lane layout as x
    """
    c_in, lanes = x_ref.shape
    c_out = o_ref.shape[0]
    x = x_ref[...]

    # Position of every lane inside its own length-L batch segment (t = lane mod L).
    pos = jax.lax.broadcasted_iota(jnp.int32, (1, lanes), 1) % L

    acc = jnp.zeros((c_out, lanes), jnp.float32)
    for k in range(K):                       # static unroll, K = 5
        d = k - PAD                          # tap k reads x[:, t + d]
        if d == 0:
            xk = x
        else:
            # Cyclic roll + per-segment mask == independent zero padding of each
            # batch element's halo (never mixes data across batch boundaries).
            xk = jnp.where((pos + d >= 0) & (pos + d < L),
                           jnp.roll(x, -d, axis=1), 0.0)
        acc += jnp.dot(w_ref[k], xk, preferred_element_type=jnp.float32)

    acc += b_ref[...]                        # (C_out, 1) broadcast over lanes
    o_ref[...] = jnp.tanh(acc).astype(o_ref.dtype)


def _pick_batch_tile(n, L):
    """Largest batch tile that (a) still leaves >=2 grid steps (lets v7x's two
    TensorCores split the 'parallel' axis), (b) keeps the lane block a multiple
    of 128 (lane-dense stores, satisfies the (8,128) BlockSpec rule), and
    (c) stays under the per-step lane budget.  If no such tile exists (tiny
    problems like the demo), fold the whole batch into a single step — the
    block then equals the full array so no alignment is required."""
    best = None
    for b in range(1, n):                    # b < n  =>  at least 2 grid steps
        if n % b == 0 and (b * L) % 128 == 0 and b * L <= _MAX_LANES:
            best = b
    return best if best is not None else n


def out_conv(x, weight, bias):
    """Forward pass of OutConv.

    x:      (N, C_in, L)       float32
    weight: (C_in, C_out, K)   PyTorch ConvTranspose1d weight layout
    bias:   (C_out,)
    returns (N, C_out, L) = tanh(conv_transpose1d(x, weight, bias, stride=1, padding=2))
    """
    n, c_in, L = x.shape
    c_out = weight.shape[1]
    b_tile = _pick_batch_tile(n, L)
    lanes = b_tile * L

    # ---- wrapper-side layout plumbing (pure transposes/reshapes; no jnp.pad) ----
    # Fold batch into the lane axis: (C_in, N*L).  In a real pipeline this
    # channel-major layout would be carried between layers to avoid the copies.
    x_flat = jnp.transpose(x, (1, 0, 2)).reshape(c_in, n * L)
    # stride-1 ConvTranspose1d == cross-correlation with the kernel flipped and
    # the channel axes swapped: w3[k, co, ci] = weight[ci, co, K-1-k].
    w3 = jnp.transpose(jnp.flip(weight, axis=2), (2, 1, 0))
    b2 = bias.reshape(c_out, 1).astype(jnp.float32)

    kernel = functools.partial(_outconv_kernel, L=L)
    y_flat = pl.pallas_call(
        kernel,
        out_shape=jax.ShapeDtypeStruct((c_out, n * L), x.dtype),
        grid=(n // b_tile,),
        in_specs=[
            pl.BlockSpec((c_in, lanes), lambda i: (0, i)),
            pl.BlockSpec((K, c_out, c_in), lambda i: (0, 0, 0)),
            pl.BlockSpec((c_out, 1), lambda i: (0, 0)),
        ],
        out_specs=pl.BlockSpec((c_out, lanes), lambda i: (0, i)),
        compiler_params=pltpu.CompilerParams(
            dimension_semantics=("parallel",)),
    )(x_flat, w3, b2)

    # Back to the PyTorch (N, C_out, L) layout.
    return jnp.transpose(y_flat.reshape(c_out, n, L), (1, 0, 2))


def reference_out_conv(x, weight, bias):
    """Direct reference matching PyTorch ConvTranspose1d(stride=1, padding=2) + tanh:
    y[n, co, t] = tanh(b[co] + sum_{ci,k} x[n, ci, s] * W[ci, co, k]),  t = s - PAD + k."""
    n, c_in, L = x.shape
    c_out = weight.shape[1]
    y = jnp.broadcast_to(bias[None, :, None], (n, c_out, L)).astype(jnp.float32)
    for k in range(K):
        contrib = jnp.einsum("ncl,co->nol", x, weight[:, :, k])     # (N, C_out, L)
        t0 = k - PAD
        src_lo = max(0, -t0)
        src_hi = min(L, L - t0)
        y = y.at[:, :, src_lo + t0:src_hi + t0].add(contrib[:, :, src_lo:src_hi])
    return jnp.tanh(y)


if __name__ == "__main__":
    key = jax.random.PRNGKey(0)
    k_x, k_w, k_b = jax.random.split(key, 3)

    batch, in_channels, out_channels, length = 2, 4, 4, 16

    x = jax.random.normal(k_x, (batch, in_channels, length), dtype=jnp.float32)
    # PyTorch ConvTranspose1d weight layout: (in_channels, out_channels, kernel_size)
    weight = 0.1 * jax.random.normal(
        k_w, (in_channels, out_channels, K), dtype=jnp.float32)
    bias = 0.1 * jax.random.normal(k_b, (out_channels,), dtype=jnp.float32)

    out = out_conv(x, weight, bias)
    jax.block_until_ready(out)
    ref = reference_out_conv(x, weight, bias)
    assert out.shape == (batch, out_channels, length)
    assert jnp.allclose(out, ref, atol=1e-5, rtol=1e-5)

    # Also exercise the multi-step, 128-lane-aligned path (batch tile < batch).
    x2 = jax.random.normal(k_x, (16, in_channels, length), dtype=jnp.float32)
    out2 = out_conv(x2, weight, bias)
    jax.block_until_ready(out2)
    ref2 = reference_out_conv(x2, weight, bias)
    assert jnp.allclose(out2, ref2, atol=1e-5, rtol=1e-5)

    print("KERNEL_OK")
</pallas_src>

<mosaic_0001>
module attributes {stable_mosaic.version = 11 : i64} {
  func.func @_outconv_kernel(%arg0: i32, %arg1: memref<4x32xf32, #tpu.memory_space<vmem>>, %arg2: memref<5x4x4xf32, #tpu.memory_space<vmem>>, %arg3: memref<4x1xf32, #tpu.memory_space<vmem>>, %arg4: memref<4x32xf32, #tpu.memory_space<vmem>>) attributes {dimension_semantics = [#tpu.dimension_semantics<parallel>], iteration_bounds = array<i64: 1>, scalar_prefetch = 0 : i64, scratch_operands = 0 : i64, tpu.core_type = #tpu.core_type<tc>, window_params = [{transform_indices = @transform_0, window_bounds = array<i64: 4, 32>}, {pipeline_mode = #tpu.pipeline_mode<synchronous>, transform_indices = @transform_1, window_bounds = array<i64: 5, 4, 4>}, {pipeline_mode = #tpu.pipeline_mode<synchronous>, transform_indices = @transform_2, window_bounds = array<i64: 4, 1>}, {transform_indices = @transform_3, window_bounds = array<i64: 4, 32>}]} {
    %c0 = arith.constant 0 : index
    %c0_0 = arith.constant 0 : index
    %0 = vector.load %arg1[%c0, %c0_0] : memref<4x32xf32, #tpu.memory_space<vmem>>, vector<4x32xf32>
    %1 = tpu.iota {dimensions = array<i32: 1>} : vector<1x32xi32>
    %c16_i32 = arith.constant 16 : i32
    %c0_i32 = arith.constant 0 : i32
    %2 = arith.cmpi eq, %c16_i32, %c0_i32 : i32
    %c1_i32 = arith.constant 1 : i32
    %3 = arith.select %2, %c1_i32, %c16_i32 : i32
    %4 = vector.broadcast %3 : i32 to vector<1x32xi32>
    %5 = arith.remsi %1, %4 : vector<1x32xi32>
    %c0_i32_1 = arith.constant 0 : i32
    %6 = vector.broadcast %c0_i32_1 : i32 to vector<1x32xi32>
    %7 = arith.cmpi ne, %5, %6 : vector<1x32xi32>
    %c0_i32_2 = arith.constant 0 : i32
    %8 = vector.broadcast %c0_i32_2 : i32 to vector<1x32xi32>
    %9 = arith.cmpi slt, %5, %8 : vector<1x32xi32>
    %c0_i32_3 = arith.constant 0 : i32
    %10 = arith.cmpi slt, %3, %c0_i32_3 : i32
    %11 = vector.broadcast %10 : i1 to vector<1x32xi1>
    %12 = vector.broadcast %11 : vector<1x32xi1> to vector<1x32xi1>
    %13 = arith.xori %9, %12 : vector<1x32xi1>
    %14 = arith.andi %13, %7 : vector<1x32xi1>
    %15 = vector.broadcast %3 : i32 to vector<1x32xi32>
    %16 = arith.addi %5, %15 : vector<1x32xi32>
    %17 = arith.select %14, %16, %5 : vector<1x32xi1>, vector<1x32xi32>
    %cst = arith.constant 0.000000e+00 : f32
    %18 = vector.broadcast %cst : f32 to vector<4x32xf32>
    %c-2_i32 = arith.constant -2 : i32
    %19 = vector.broadcast %c-2_i32 : i32 to vector<1x32xi32>
    %20 = arith.addi %17, %19 : vector<1x32xi32>
    %c0_i32_4 = arith.constant 0 : i32
    %21 = vector.broadcast %c0_i32_4 : i32 to vector<1x32xi32>
    %22 = arith.cmpi sge, %20, %21 : vector<1x32xi32>
    %c-2_i32_5 = arith.constant -2 : i32
    %23 = vector.broadcast %c-2_i32_5 : i32 to vector<1x32xi32>
    %24 = arith.addi %17, %23 : vector<1x32xi32>
    %c16_i32_6 = arith.constant 16 : i32
    %25 = vector.broadcast %c16_i32_6 : i32 to vector<1x32xi32>
    %26 = arith.cmpi slt, %24, %25 : vector<1x32xi32>
    %27 = arith.andi %22, %26 : vector<1x32xi1>
    %28 = vector.extract_strided_slice %0 {offsets = [0, 30], sizes = [4, 2], strides = [1, 1]} : vector<4x32xf32> to vector<4x2xf32>
    %29 = vector.extract_strided_slice %0 {offsets = [0, 0], sizes = [4, 30], strides = [1, 1]} : vector<4x32xf32> to vector<4x30xf32>
    %30 = tpu.concatenate %28, %29 in 1 : vector<4x2xf32>, vector<4x30xf32> -> vector<4x32xf32>
    %cst_7 = arith.constant 0.000000e+00 : f32
    %31 = vector.shape_cast %27 : vector<1x32xi1> to vector<1x32xi1>
    %32 = vector.broadcast %31 : vector<1x32xi1> to vector<4x32xi1>
    %33 = vector.broadcast %cst_7 : f32 to vector<4x32xf32>
    %34 = arith.select %32, %30, %33 : vector<4x32xi1>, vector<4x32xf32>
    %c0_8 = arith.constant 0 : index
    %c0_9 = arith.constant 0 : index
    %c0_10 = arith.constant 0 : index
    %35 = vector.load %arg2[%c0_8, %c0_9, %c0_10] : memref<5x4x4xf32, #tpu.memory_space<vmem>>, vector<1x4x4xf32>
    %36 = vector.shape_cast %35 : vector<1x4x4xf32> to vector<4x4xf32>
    %cst_11 = arith.constant dense<0.000000e+00> : vector<4x32xf32>
    %37 = tpu.matmul %36, %34, %cst_11 {dimension_numbers = #tpu.dot_dimension_numbers<[1], [0], [0], [1], [0, 0, 1, 1], [], []>} : vector<4x4xf32>, vector<4x32xf32>, vector<4x32xf32> -> vector<4x32xf32>
    %38 = arith.addf %18, %37 : vector<4x32xf32>
    %c-1_i32 = arith.constant -1 : i32
    %39 = vector.broadcast %c-1_i32 : i32 to vector<1x32xi32>
    %40 = arith.addi %17, %39 : vector<1x32xi32>
    %c0_i32_12 = arith.constant 0 : i32
    %41 = vector.broadcast %c0_i32_12 : i32 to vector<1x32xi32>
    %42 = arith.cmpi sge, %40, %41 : vector<1x32xi32>
    %c-1_i32_13 = arith.constant -1 : i32
    %43 = vector.broadcast %c-1_i32_13 : i32 to vector<1x32xi32>
    %44 = arith.addi %17, %43 : vector<1x32xi32>
    %c16_i32_14 = arith.constant 16 : i32
    %45 = vector.broadcast %c16_i32_14 : i32 to vector<1x32xi32>
    %46 = arith.cmpi slt, %44, %45 : vector<1x32xi32>
    %47 = arith.andi %42, %46 : vector<1x32xi1>
    %48 = vector.extract_strided_slice %0 {offsets = [0, 31], sizes = [4, 1], strides = [1, 1]} : vector<4x32xf32> to vector<4x1xf32>
    %49 = vector.extract_strided_slice %0 {offsets = [0, 0], sizes = [4, 31], strides = [1, 1]} : vector<4x32xf32> to vector<4x31xf32>
    %50 = tpu.concatenate %48, %49 in 1 : vector<4x1xf32>, vector<4x31xf32> -> vector<4x32xf32>
    %cst_15 = arith.constant 0.000000e+00 : f32
    %51 = vector.shape_cast %47 : vector<1x32xi1> to vector<1x32xi1>
    %52 = vector.broadcast %51 : vector<1x32xi1> to vector<4x32xi1>
    %53 = vector.broadcast %cst_15 : f32 to vector<4x32xf32>
    %54 = arith.select %52, %50, %53 : vector<4x32xi1>, vector<4x32xf32>
    %c1 = arith.constant 1 : index
    %c0_16 = arith.constant 0 : index
    %c0_17 = arith.constant 0 : index
    %55 = vector.load %arg2[%c1, %c0_16, %c0_17] : memref<5x4x4xf32, #tpu.memory_space<vmem>>, vector<1x4x4xf32>
    %56 = vector.shape_cast %55 : vector<1x4x4xf32> to vector<4x4xf32>
    %cst_18 = arith.constant dense<0.000000e+00> : vector<4x32xf32>
    %57 = tpu.matmul %56, %54, %cst_18 {dimension_numbers = #tpu.dot_dimension_numbers<[1], [0], [0], [1], [0, 0, 1, 1], [], []>} : vector<4x4xf32>, vector<4x32xf32>, vector<4x32xf32> -> vector<4x32xf32>
    %58 = arith.addf %38, %57 : vector<4x32xf32>
    %c2 = arith.constant 2 : index
    %c0_19 = arith.constant 0 : index
    %c0_20 = arith.constant 0 : index
    %59 = vector.load %arg2[%c2, %c0_19, %c0_20] : memref<5x4x4xf32, #tpu.memory_space<vmem>>, vector<1x4x4xf32>
    %60 = vector.shape_cast %59 : vector<1x4x4xf32> to vector<4x4xf32>
    %cst_21 = arith.constant dense<0.000000e+00> : vector<4x32xf32>
    %61 = tpu.matmul %60, %0, %cst_21 {dimension_numbers = #tpu.dot_dimension_numbers<[1], [0], [0], [1], [0, 0, 1, 1], [], []>} : vector<4x4xf32>, vector<4x32xf32>, vector<4x32xf32> -> vector<4x32xf32>
    %62 = arith.addf %58, %61 : vector<4x32xf32>
    %c1_i32_22 = arith.constant 1 : i32
    %63 = vector.broadcast %c1_i32_22 : i32 to vector<1x32xi32>
    %64 = arith.addi %17, %63 : vector<1x32xi32>
    %c0_i32_23 = arith.constant 0 : i32
    %65 = vector.broadcast %c0_i32_23 : i32 to vector<1x32xi32>
    %66 = arith.cmpi sge, %64, %65 : vector<1x32xi32>
    %c1_i32_24 = arith.constant 1 : i32
    %67 = vector.broadcast %c1_i32_24 : i32 to vector<1x32xi32>
    %68 = arith.addi %17, %67 : vector<1x32xi32>
    %c16_i32_25 = arith.constant 16 : i32
    %69 = vector.broadcast %c16_i32_25 : i32 to vector<1x32xi32>
    %70 = arith.cmpi slt, %68, %69 : vector<1x32xi32>
    %71 = arith.andi %66, %70 : vector<1x32xi1>
    %72 = vector.extract_strided_slice %0 {offsets = [0, 1], sizes = [4, 31], strides = [1, 1]} : vector<4x32xf32> to vector<4x31xf32>
    %73 = vector.extract_strided_slice %0 {offsets = [0, 0], sizes = [4, 1], strides = [1, 1]} : vector<4x32xf32> to vector<4x1xf32>
    %74 = tpu.concatenate %72, %73 in 1 : vector<4x31xf32>, vector<4x1xf32> -> vector<4x32xf32>
    %cst_26 = arith.constant 0.000000e+00 : f32
    %75 = vector.shape_cast %71 : vector<1x32xi1> to vector<1x32xi1>
    %76 = vector.broadcast %75 : vector<1x32xi1> to vector<4x32xi1>
    %77 = vector.broadcast %cst_26 : f32 to vector<4x32xf32>
    %78 = arith.select %76, %74, %77 : vector<4x32xi1>, vector<4x32xf32>
    %c3 = arith.constant 3 : index
    %c0_27 = arith.constant 0 : index
    %c0_28 = arith.constant 0 : index
    %79 = vector.load %arg2[%c3, %c0_27, %c0_28] : memref<5x4x4xf32, #tpu.memory_space<vmem>>, vector<1x4x4xf32>
    %80 = vector.shape_cast %79 : vector<1x4x4xf32> to vector<4x4xf32>
    %cst_29 = arith.constant dense<0.000000e+00> : vector<4x32xf32>
    %81 = tpu.matmul %80, %78, %cst_29 {dimension_numbers = #tpu.dot_dimension_numbers<[1], [0], [0], [1], [0, 0, 1, 1], [], []>} : vector<4x4xf32>, vector<4x32xf32>, vector<4x32xf32> -> vector<4x32xf32>
    %82 = arith.addf %62, %81 : vector<4x32xf32>
    %c2_i32 = arith.constant 2 : i32
    %83 = vector.broadcast %c2_i32 : i32 to vector<1x32xi32>
    %84 = arith.addi %17, %83 : vector<1x32xi32>
    %c0_i32_30 = arith.constant 0 : i32
    %85 = vector.broadcast %c0_i32_30 : i32 to vector<1x32xi32>
    %86 = arith.cmpi sge, %84, %85 : vector<1x32xi32>
    %c2_i32_31 = arith.constant 2 : i32
    %87 = vector.broadcast %c2_i32_31 : i32 to vector<1x32xi32>
    %88 = arith.addi %17, %87 : vector<1x32xi32>
    %c16_i32_32 = arith.constant 16 : i32
    %89 = vector.broadcast %c16_i32_32 : i32 to vector<1x32xi32>
    %90 = arith.cmpi slt, %88, %89 : vector<1x32xi32>
    %91 = arith.andi %86, %90 : vector<1x32xi1>
    %92 = vector.extract_strided_slice %0 {offsets = [0, 2], sizes = [4, 30], strides = [1, 1]} : vector<4x32xf32> to vector<4x30xf32>
    %93 = vector.extract_strided_slice %0 {offsets = [0, 0], sizes = [4, 2], strides = [1, 1]} : vector<4x32xf32> to vector<4x2xf32>
    %94 = tpu.concatenate %92, %93 in 1 : vector<4x30xf32>, vector<4x2xf32> -> vector<4x32xf32>
    %cst_33 = arith.constant 0.000000e+00 : f32
    %95 = vector.shape_cast %91 : vector<1x32xi1> to vector<1x32xi1>
    %96 = vector.broadcast %95 : vector<1x32xi1> to vector<4x32xi1>
    %97 = vector.broadcast %cst_33 : f32 to vector<4x32xf32>
    %98 = arith.select %96, %94, %97 : vector<4x32xi1>, vector<4x32xf32>
    %c4 = arith.constant 4 : index
    %c0_34 = arith.constant 0 : index
    %c0_35 = arith.constant 0 : index
    %99 = vector.load %arg2[%c4, %c0_34, %c0_35] : memref<5x4x4xf32, #tpu.memory_space<vmem>>, vector<1x4x4xf32>
    %100 = vector.shape_cast %99 : vector<1x4x4xf32> to vector<4x4xf32>
    %cst_36 = arith.constant dense<0.000000e+00> : vector<4x32xf32>
    %101 = tpu.matmul %100, %98, %cst_36 {dimension_numbers = #tpu.dot_dimension_numbers<[1], [0], [0], [1], [0, 0, 1, 1], [], []>} : vector<4x4xf32>, vector<4x32xf32>, vector<4x32xf32> -> vector<4x32xf32>
    %102 = arith.addf %82, %101 : vector<4x32xf32>
    %c0_37 = arith.constant 0 : index
    %c0_38 = arith.constant 0 : index
    %103 = vector.load %arg3[%c0_37, %c0_38] : memref<4x1xf32, #tpu.memory_space<vmem>>, vector<4x1xf32>
    %104 = vector.broadcast %103 : vector<4x1xf32> to vector<4x32xf32>
    %105 = arith.addf %102, %104 : vector<4x32xf32>
    %106 = math.tanh %105 : vector<4x32xf32>
    %c0_39 = arith.constant 0 : index
    %c0_40 = arith.constant 0 : index
    %107 = vector.load %arg4[%c0_39, %c0_40] : memref<4x32xf32, #tpu.memory_space<vmem>>, vector<4x32xf32>
    tpu.vector_store %arg4[%c0_39, %c0_40], %106 {strides = array<i32>} : memref<4x32xf32, #tpu.memory_space<vmem>>, vector<4x32xf32>,
    return
  }
  func.func @transform_0(%arg0: i32) -> (i32, i32) {
    %c0_i32 = arith.constant 0 : i32
    %c0_i32_0 = arith.constant 0 : i32
    return %c0_i32, %arg0 : i32, i32
  }
  func.func @transform_1(%arg0: i32) -> (i32, i32, i32) {
    %c0_i32 = arith.constant 0 : i32
    %c0_i32_0 = arith.constant 0 : i32
    %c0_i32_1 = arith.constant 0 : i32
    %c0_i32_2 = arith.constant 0 : i32
    return %c0_i32, %c0_i32_0, %c0_i32_1 : i32, i32, i32
  }
  func.func @transform_2(%arg0: i32) -> (i32, i32) {
    %c0_i32 = arith.constant 0 : i32
    %c0_i32_0 = arith.constant 0 : i32
    %c0_i32_1 = arith.constant 0 : i32
    return %c0_i32, %c0_i32_0 : i32, i32
  }
  func.func @transform_3(%arg0: i32) -> (i32, i32) {
    %c0_i32 = arith.constant 0 : i32
    %c0_i32_0 = arith.constant 0 : i32
    return %c0_i32, %arg0 : i32, i32
  }
}

</mosaic_0001>

<bundles_post_ra>
// kernel: tpu_custom_call.1
= control target key start
LH: loop header
LB: loop body
LE: loop exit
PB: predicated region body
PF: predicated region fallthrough
CT: control target
= control target key end

     0   :  { %s378_s0 = inlined_call_operand.vmem [shape: f32[4,32], index: 0, kind: input, shape index: {}]   ;;  %s379_s1 = inlined_call_operand.vmem [shape: f32[5,4,4], index: 1, kind: input, shape index: {}]   ;;  %s380_s2 = inlined_call_operand.vmem [shape: f32[4,1], index: 2, kind: input, shape index: {}]   ;;  %s381_s3 = inlined_call_operand.hbm [shape: f32[4,32], index: 3, kind: output, shape index: {}]  }
   0x1   :  { %v15_v0 = vld [vmem:[%s378_s0] sm:$0xf] }
   0x2   :  { %8 = vsyncpa [#allocation3], 0  ;;  %s314_s14 = smov 127   ;;  %s315_s15 = smov 97   ;;  %v16_v1 = vlaneseq  ;;  %vm68_vm0 = vcmask 1043456   ;;  %vm64_vm1 = vcmask 31744  }
   0x3   :  { %150 = vrot.lane.b32.xlu1 %v15_v0, %s314_s14  ;;  %51 = vrot.lane.b32.xlu0 %v15_v0, %s315_s15  ;;  %s316_s16 = smov 98   ;;  %s317_s17 = smov 31   ;;  %v265_v3 = vld [vmem:[%s379_s1 + $0x8] sm:$0xf]  ;;  %vm41_vm2 = vcmask 15360   ;;  %v322_v12 = vmov 0  }
   0x4   :  { %35 = vrot.lane.b32.xlu2 %v15_v0, %s316_s16  ;;  %s318_s18 = smov 1   ;;  %s319_s19 = smov 2   ;;  %266 = vmatpush.msk.msra.mxu2 %vm68_vm0, %v15_v0  ;;  %v17_v2 = vand.u32 127, %v16_v1  ;;  %v46_v9 = vld [vmem:[%s379_s1] sm:$0xf]  ;;  %vm57_vm4 = vcmask 7168  }
   0x5   :  { %s320_s20 = smov 30   ;;  %s321_s21 = smov 126   ;;  %267 = vmatmul.msk.f32.vlgmr.msra.gmra.mxu2 %vm64_vm1, %v265_v3  ;;  %v234_v10 = vld [vmem:[%s380_s2] sm:$0xf]  ;;  %284 = vset.pattern.permute.xlu2 %v322_v12  ;;  %vm156_vm5 = vcmask 252928   ;;  %vm200_vm8 = vcmask 244736  }
   0x6   :  { %v22_v4 = vand.u32 15, %v17_v2  ;;  %285 = vset.pattern.permute.xlu0 %v322_v12  ;;  %v260_v21 = vld [vmem:[%s379_s1 + $0x4] sm:$0xf]  ;;  %v268_v22 = vld [vmem:[%s379_s1 + $0xc] sm:$0xf]  ;;  %s323_s5 = smov [#allocation2]  }
   0x7   :  { %v271_v29 = vld [vmem:[%s379_s1 + $0x10] sm:$0xf]  ;;  %s249_s6 = sshll.u32 %s323_s5, 4  ;;  %s251_s8 = sshll.u32 %s381_s3, 4  ;;  %vm242_vm10 = vcmask 257024   ;;  %s250_s6 = int_to_ptr.vmem [resolvable:$true] %s249_s6  ;;  %s252_s8 = int_to_ptr.hbm [resolvable:$true] %s251_s8 }
   0x8   :  { %v30_v6 = vadd.s32 4294967294, %v22_v4  ;;  %v47_v15 = vadd.s32 4294967295, %v22_v4  ;;  %v146_v16 = vadd.s32 1, %v22_v4  ;;  %v190_v25 = vadd.s32 2, %v22_v4 }
   0xa   :  { %vm31_vm3 = vcmp.ge.s32.totalorder %v30_v6, 0  ;;  %vm48_vm6 = vcmp.ge.s32.totalorder %v47_v15, 0  ;;  %vm148_vm7 = vcmp.lt.s32.totalorder %v146_v16, 16  ;;  %vm192_vm9 = vcmp.lt.s32.totalorder %v190_v25, 16 }
   0xb   :  { %153 = vrot.lane.b32.xlu1 %v15_v0, %s317_s17  ;;  %54 = vrot.lane.b32.xlu0 %v15_v0, %s318_s18 }
   0xc   :  { %38 = vrot.lane.b32.xlu2 %v15_v0, %s319_s19 }
  0x13   :  { %197 = vrot.lane.b32.xlu1 %v15_v0, %s320_s20  ;;  %194 = vrot.lane.b32.xlu0 %v15_v0, %s321_s21 }
  0x14   :  { %237 = vperm.xlu2 %284, %v234_v10  }
  0x5e   :  { %v36_v5 = vpop.permute.xlu2 %35 }
  0x66   :  { %v39_v7 = vpop.permute.xlu2 %38 }
  0x67   :  { %v42_v8 = vsel %vm41_vm2, %v36_v5, %v39_v7 }
  0x68   :  { %v45_v11 = vsel %vm31_vm3, %v42_v8, 0.0 }
  0x69   :  { %263 = vmatpush.msk.msra.mxu1 %vm68_vm0, %v45_v11 }
  0x6a   :  { %264 = vmatmul.msk.f32.vlgmr.msra.gmra.mxu1 %vm64_vm1, %v46_v9 }
  0x6e   :  { %v238_v39 = vpop.permute.xlu2 %237 }
  0x75   :  { %v151_v13 = vpop.permute.xlu1 %150  ;;  %v52_v14 = vpop.permute.xlu0 %51 }
  0x7d   :  { %v154_v17 = vpop.permute.xlu1 %153  ;;  %v55_v18 = vpop.permute.xlu0 %54 }
  0x7e   :  { %v58_v19 = vsel %vm57_vm4, %v52_v14, %v55_v18  ;;  %v157_v20 = vsel %vm156_vm5, %v151_v13, %v154_v17 }
  0x7f   :  { %v61_v23 = vsel %vm48_vm6, %v58_v19, 0.0  ;;  %v160_v24 = vsel %vm148_vm7, %v157_v20, 0.0 }
  0x80   :  { %261 = vmatpush.msk.msra.mxu0 %vm68_vm0, %v61_v23  ;;  %269 = vmatpush.msk.msra.mxu3 %vm68_vm0, %v160_v24 }
  0x81   :  { %262 = vmatmul.msk.f32.vlgmr.msra.gmra.mxu0 %vm64_vm1, %v260_v21  ;;  %270 = vmatmul.msk.f32.vlgmr.msra.gmra.mxu3 %vm64_vm1, %v268_v22 }
  0x85   :  { %v198_v26 = vpop.permute.xlu1 %197  ;;  %v195_v27 = vpop.permute.xlu0 %194 }
  0x86   :  { %v201_v28 = vsel %vm200_vm8, %v195_v27, %v198_v26 }
  0x87   :  { %v204_v30 = vsel %vm192_vm9, %v201_v28, 0.0 }
  0x88   :  { %272 = vmatpush.msk.msrb.mxu0 %vm68_vm0, %v204_v30  ;;  %v142_v34 = vpop.f32.mrf.mxu2 }
  0x89   :  { %273 = vmatmul.msk.f32.vlgmr.msrb.gmra.mxu0 %vm64_vm1, %v271_v29 }
  0xe7   :  { %v115_v31 = vpop.f32.mrf.mxu1 }
  0xfe   :  { %v89_v32 = vpop.f32.mrf.mxu0 }
  0xff   :  { %v116_v33 = vadd.f32 %v115_v31, %v89_v32 }
 0x101   :  { %v145_v35 = vadd.f32 %v142_v34, %v116_v33 }
 0x104   :  { %v186_v36 = vpop.f32.mrf.mxu3 }
 0x105   :  { %v189_v37 = vadd.f32 %v186_v36, %v145_v35 }
 0x106   :  { %v230_v38 = vpop.f32.mrf.mxu0 }
 0x107   :  { %v233_v40 = vadd.f32 %v230_v38, %v189_v37 }
 0x109   :  { %v240_v41 = vadd.f32 %v238_v39, %v233_v40 }
 0x10b   :  { %286 = vtanh.f32 %v240_v41 }
 0x111   :  { %v287_v42 = vpop.eup %286 }
 0x112   :  { %243 = vst.msk [vmem:[#allocation2] sm:$0xf] %vm242_vm10, %v287_v42 }
 0x113   :  { %254 = dma.vmem_to_hbm [thread:$0]  %s250_s6, 64, %s252_s8, [#allocation3]  }
 0x114   :  { %312 = dma.done.wait [#allocation3], 64  }
 0x115   :  { %313 = vsyncadd [#allocation3], 4294967232 }
 0x116   :  { %259 = vsyncpa [#allocation3], 1 }

</bundles_post_ra>
